<compile_context>
chip_gen: v7x
topology: tpu7x:2x2x1
jax: 0.10.0
libtpu: 0.0.40
codegen_flags: <defaults>
</compile_context>

<pallas_src>
import functools

import jax
import jax.numpy as jnp
import numpy as np
from jax.experimental import pallas as pl
from jax.experimental.pallas import tpu as pltpu

# (start plane, num classes, target column) for the three heads (reference only).
_HEADS = ((0, 3, 0), (3, 2, 1), (5, 2, 2))


def _tuv_ce_kernel(y_ref, t_ref, len_ref, o_ref, acc_ref):
    """Grid = (P batch chunks ["parallel"], time blocks ["arbitrary"]).

    y_ref:   (7, Bp, Tb)  logits, class-major planes (native dtype)
    t_ref:   (Bp, Tb)     int32 packed labels: turn | utt<<2 | vad<<3
    len_ref: (Bp, 1)      int32 valid lengths (clamped to T; 0 for padded rows)
    o_ref:   (Bp, 1)      f32 per-batch loss (sum of 3 head means)
    acc_ref: (Bp, 128)    f32 lane-dense running time-sum of nll (scratch)

    NOTE: blocks may be ragged on both the batch and time axes (no wrapper-side
    padding). Out-of-bounds block contents are undefined; the `valid` mask /
    zero lengths neutralize them BEFORE any reduction — do not reorder.
    """
    tb = pl.program_id(1)
    nt = pl.num_programs(1)

    @pl.when(tb == 0)
    def _init():
        acc_ref[...] = jnp.zeros_like(acc_ref)

    Bp, Tb = t_ref.shape

    lens = len_ref[...]                                          # (Bp, 1) i32

    # Validity mask for this time tile: global time index < y_len[b].
    time_idx = jax.lax.broadcasted_iota(jnp.int32, (Bp, Tb), 1) + tb * Tb
    valid = time_idx < lens                                      # (Bp, Tb)

    packed = t_ref[...]
    lab_turn = packed & 3
    lab_utt = (packed >> 2) & 1
    lab_vad = (packed >> 3) & 1

    def plane(c):
        return y_ref[c].astype(jnp.float32)                      # (Bp, Tb)

    # ---- turn head (3 classes): LSE with the exp(max-max)==1 term folded into
    # log1p -> only 2 exps.  Non-max pair selected with cheap VPU compares. ----
    l0, l1, l2 = plane(0), plane(1), plane(2)
    hi01 = jnp.maximum(l0, l1)
    lo01 = jnp.minimum(l0, l1)
    m3 = jnp.maximum(hi01, l2)
    two_is_max = l2 >= hi01
    p1 = jnp.where(two_is_max, hi01, lo01)
    p2 = jnp.where(two_is_max, lo01, l2)
    r3 = jnp.exp(p1 - m3) + jnp.exp(p2 - m3)                     # in (0, 2]
    sel3 = jnp.where(lab_turn == 0, l0, jnp.where(lab_turn == 1, l1, l2))

    # ---- 2-class heads: LSE = max(a,b) + log1p(exp(-|a-b|)). ----
    a_u, b_u = plane(3), plane(4)
    a_v, b_v = plane(5), plane(6)
    m_u = jnp.maximum(a_u, b_u)
    m_v = jnp.maximum(a_v, b_v)
    e_u = jnp.exp(-jnp.abs(a_u - b_u))                           # in (0, 1]
    e_v = jnp.exp(-jnp.abs(a_v - b_v))
    sel_u = jnp.where(lab_utt == 0, a_u, b_u)
    sel_v = jnp.where(lab_vad == 0, a_v, b_v)

    # Fuse the three logs:
    #   log1p(r3) + log1p(e_u) + log1p(e_v) = log1p(r3 + s + r3*s),
    #   with s = e_u + e_v + e_u*e_v.   (argument <= ~11, f32-safe)
    s2 = e_u + e_v + e_u * e_v
    fused_log = jnp.log1p(r3 + s2 + r3 * s2)

    nll = (m3 + m_u + m_v + fused_log) - (sel3 + sel_u + sel_v)
    nll = jnp.where(valid, nll, 0.0)                             # mask BEFORE reduce

    # Lane-dense accumulation: fold Tb into 128-lane partial sums (VALU adds),
    # single cross-lane reduce deferred to the finalize step.
    n_full = Tb // 128
    rem = Tb - n_full * 128
    if n_full:
        partial = nll[:, 0:128]
        for j in range(1, n_full):
            partial = partial + nll[:, j * 128:(j + 1) * 128]
        acc_ref[...] += partial
    if rem:
        acc_ref[:, :rem] += nll[:, n_full * 128:]

    @pl.when(tb == nt - 1)
    def _finalize():
        row_sum = jnp.sum(acc_ref[...], axis=-1, keepdims=True)  # (Bp, 1)
        lens_f = lens.astype(jnp.float32)
        denom = jnp.where(lens > 0, lens_f, 1.0)                 # exact division
        o_ref[...] = jnp.where(lens > 0, row_sum / denom, 0.0)


def _default_num_parallel(batch):
    """P=2 only on chips with two TensorCores per chip (megacore); else 1."""
    if batch < 16:
        return 1
    try:
        kind = jax.devices()[0].device_kind.lower()
    except Exception:
        return 1
    if "v7" in kind or "v4" in kind:
        return 2
    return 1


def _choose_batch_split(B, P):
    """Pick (P, Bp) with Bp sublane-aligned and every chunk holding real rows."""
    P = max(1, int(P))
    while P > 1:
        Bp = -(-B // P)
        Bp = -(-Bp // 8) * 8
        if (P - 1) * Bp < B:       # last chunk still starts inside the array
            return P, Bp
        P -= 1
    return 1, B


def _choose_time_tile(T, Bp, y_itemsize, time_block):
    """Tb multiple of 128 (or == T), clamped so 2x(inputs) stays <= ~24 MiB."""
    token_bytes = 7 * y_itemsize + 4               # logits + packed label / (b,t)
    budget = 24 * 1024 * 1024                      # double-buffered input budget
    max_tokens = max(budget // (2 * token_bytes), 128)
    tb_cap = max(128, ((max_tokens // max(Bp, 1)) // 128) * 128)
    tb_req = max(128, (int(time_block) // 128) * 128)
    tb_lim = min(tb_req, tb_cap)
    if T <= tb_lim:
        return T, 1                                # single block covers full T
    Tb = min(tb_lim, (T // 128) * 128)
    return Tb, -(-T // Tb)


@functools.partial(jax.jit, static_argnames=("time_block", "num_parallel"))
def turn_utterance_vad_ce_loss(y, t, y_len, *, time_block=4096, num_parallel=None):
    """y: (T, B, 7) float, t: (T, B, 3) int, y_len: (B,) int -> scalar f32."""
    T, B, C = y.shape
    assert C == 7 and t.shape == (T, B, 3) and y_len.shape == (B,)

    # Clamp lengths to T so the mean denominator matches PyTorch's y[:L] slice.
    lens = jnp.minimum(y_len.astype(jnp.int32), T)

    # Class-major, lane-dense logits: (7, B, T) — lane axis = time.
    y_cm = jnp.transpose(y, (2, 1, 0))

    # Pack the 3 label columns into one int32 plane BEFORE the transpose.
    t32 = t.astype(jnp.int32)
    packed = t32[:, :, 0] | (t32[:, :, 1] << 2) | (t32[:, :, 2] << 3)   # (T, B)
    t_bt = jnp.transpose(packed)                                        # (B, T)

    P = num_parallel if num_parallel is not None else _default_num_parallel(B)
    P, Bp = _choose_batch_split(B, P)
    B_pad = Bp * P
    Tb, nt = _choose_time_tile(T, Bp, jnp.dtype(y.dtype).itemsize, time_block)

    # Only the tiny length vector is padded (ragged blocks handle y / t).
    lens_col = lens
    if B_pad > B:
        lens_col = jnp.pad(lens_col, (0, B_pad - B))
    lens_col = lens_col.reshape(B_pad, 1)

    token_bytes = 7 * jnp.dtype(y.dtype).itemsize + 4
    vmem_limit = int(2 * Bp * Tb * token_bytes + Bp * 128 * 4 + (4 << 20))
    vmem_limit = max(vmem_limit, 16 << 20)

    per_batch = pl.pallas_call(
        _tuv_ce_kernel,
        out_shape=jax.ShapeDtypeStruct((B_pad, 1), jnp.float32),
        grid_spec=pltpu.PrefetchScalarGridSpec(
            num_scalar_prefetch=0,
            grid=(P, nt),
            in_specs=[
                pl.BlockSpec((7, Bp, Tb), lambda p, k: (0, p, k)),
                pl.BlockSpec((Bp, Tb), lambda p, k: (p, k)),
                pl.BlockSpec((Bp, 1), lambda p, k: (p, 0)),
            ],
            out_specs=pl.BlockSpec((Bp, 1), lambda p, k: (p, 0)),
            scratch_shapes=[pltpu.VMEM((Bp, 128), jnp.float32)],
        ),
        compiler_params=pltpu.CompilerParams(
            dimension_semantics=("parallel", "arbitrary"),
            vmem_limit_bytes=vmem_limit),
    )(y_cm, t_bt, lens_col)

    # Tiny epilogue: sum per-batch losses, divide by the (original) batch size.
    return jnp.sum(per_batch) / jnp.float32(B)


def _reference_loss(y, t, y_len):
    """Numpy (float64) reference matching the PyTorch forward loop exactly."""
    y = np.asarray(y, np.float64)
    t = np.asarray(t)
    T, B, _ = y.shape
    lens = np.minimum(np.asarray(y_len), T)
    total = 0.0
    for i in range(B):
        L = int(lens[i])
        if L == 0:
            continue
        for start, ncls, col in _HEADS:
            logits = y[:L, i, start:start + ncls]
            lab = t[:L, i, col]
            m = logits.max(-1, keepdims=True)
            logp = logits - m - np.log(np.exp(logits - m).sum(-1, keepdims=True))
            total += -logp[np.arange(L), lab].mean()
    return total / B


def _make_inputs(key, T, B):
    k1, k2, k3, k4, k5 = jax.random.split(key, 5)
    y = jax.random.normal(k1, (T, B, 7), dtype=jnp.float32)
    t = jnp.concatenate([
        jax.random.randint(k2, (T, B, 1), 0, 3, dtype=jnp.int32),
        jax.random.randint(k3, (T, B, 1), 0, 2, dtype=jnp.int32),
        jax.random.randint(k4, (T, B, 1), 0, 2, dtype=jnp.int32),
    ], axis=-1)
    y_len = jax.random.randint(k5, (B,), 0, T + 1, dtype=jnp.int32)
    return y, t, y_len


if __name__ == "__main__":
    key = jax.random.PRNGKey(0)
    k_small, k_med, k_par = jax.random.split(key, 3)

    # --- small sanity check: single (ragged) time block, P=1 ---
    T, B = 8, 4
    y, t, _ = _make_inputs(k_small, T, B)
    y_len = jnp.array([8, 5, 0, 3], dtype=jnp.int32)   # includes a skipped (0) entry
    loss = jax.block_until_ready(turn_utterance_vad_ce_loss(y, t, y_len))
    ref = _reference_loss(y, t, y_len)
    assert np.allclose(np.asarray(loss), ref, rtol=1e-4, atol=1e-5), (loss, ref)

    # --- time tiling with a ragged last time block (T=200, Tb=128) ---
    T2, B2 = 200, 32
    y2, t2, y_len2 = _make_inputs(k_med, T2, B2)
    loss2 = jax.block_until_ready(
        turn_utterance_vad_ce_loss(y2, t2, y_len2, time_block=128))
    ref2 = _reference_loss(y2, t2, y_len2)
    assert np.allclose(np.asarray(loss2), ref2, rtol=1e-4, atol=1e-5), (loss2, ref2)

    # --- explicit 2-way parallel split with ragged batch AND time blocks ---
    T3, B3 = 130, 20
    y3, t3, y_len3 = _make_inputs(k_par, T3, B3)
    loss3 = jax.block_until_ready(
        turn_utterance_vad_ce_loss(y3, t3, y_len3, time_block=128, num_parallel=2))
    ref3 = _reference_loss(y3, t3, y_len3)
    assert np.allclose(np.asarray(loss3), ref3, rtol=1e-4, atol=1e-5), (loss3, ref3)

    print("KERNEL_OK")
</pallas_src>

<mosaic_0001>
module attributes {stable_mosaic.version = 11 : i64} {
  func.func @_tuv_ce_kernel(%arg0: i32, %arg1: i32, %arg2: memref<7x4x8xf32, #tpu.memory_space<vmem>>, %arg3: memref<4x8xi32, #tpu.memory_space<vmem>>, %arg4: memref<4x1xi32, #tpu.memory_space<vmem>>, %arg5: memref<4x1xf32, #tpu.memory_space<vmem>>, %arg6: memref<4x128xf32, #tpu.memory_space<vmem>>) attributes {dimension_semantics = [#tpu.dimension_semantics<parallel>, #tpu.dimension_semantics<arbitrary>], iteration_bounds = array<i64: 1, 1>, scalar_prefetch = 0 : i64, scratch_operands = 1 : i64, tpu.core_type = #tpu.core_type<tc>, window_params = [{transform_indices = @transform_0, window_bounds = array<i64: 7, 4, 8>}, {transform_indices = @transform_1, window_bounds = array<i64: 4, 8>}, {transform_indices = @transform_2, window_bounds = array<i64: 4, 1>}, {transform_indices = @transform_3, window_bounds = array<i64: 4, 1>}]} {
    %c0_i32 = arith.constant 0 : i32
    %0 = arith.cmpi eq, %arg1, %c0_i32 : i32
    %1 = arith.extui %0 : i1 to i32
    %c0_i32_0 = arith.constant 0 : i32
    %2 = arith.cmpi ne, %1, %c0_i32_0 : i32
    scf.if %2 {
      %cst_33 = arith.constant 0.000000e+00 : f32
      %91 = vector.broadcast %cst_33 : f32 to vector<4x128xf32>
      %c0_34 = arith.constant 0 : index
      %c0_35 = arith.constant 0 : index
      %92 = vector.load %arg6[%c0_34, %c0_35] : memref<4x128xf32, #tpu.memory_space<vmem>>, vector<4x128xf32>
      tpu.vector_store %arg6[%c0_34, %c0_35], %91 {strides = array<i32>} : memref<4x128xf32, #tpu.memory_space<vmem>>, vector<4x128xf32>,
    } else {
    }
    %c0 = arith.constant 0 : index
    %c0_1 = arith.constant 0 : index
    %3 = vector.load %arg4[%c0, %c0_1] : memref<4x1xi32, #tpu.memory_space<vmem>>, vector<4x1xi32>
    %4 = tpu.iota {dimensions = array<i32: 1>} : vector<4x8xi32>
    %c8_i32 = arith.constant 8 : i32
    %5 = arith.muli %arg1, %c8_i32 : i32
    %6 = vector.broadcast %5 : i32 to vector<4x8xi32>
    %7 = arith.addi %4, %6 : vector<4x8xi32>
    %8 = vector.broadcast %3 : vector<4x1xi32> to vector<4x8xi32>
    %9 = arith.cmpi slt, %7, %8 : vector<4x8xi32>
    %c0_2 = arith.constant 0 : index
    %c0_3 = arith.constant 0 : index
    %10 = vector.load %arg3[%c0_2, %c0_3] : memref<4x8xi32, #tpu.memory_space<vmem>>, vector<4x8xi32>
    %c3_i32 = arith.constant 3 : i32
    %11 = vector.broadcast %c3_i32 : i32 to vector<4x8xi32>
    %12 = arith.andi %10, %11 : vector<4x8xi32>
    %c2_i32 = arith.constant 2 : i32
    %13 = vector.broadcast %c2_i32 : i32 to vector<4x8xi32>
    %14 = arith.shrsi %10, %13 : vector<4x8xi32>
    %c1_i32 = arith.constant 1 : i32
    %15 = vector.broadcast %c1_i32 : i32 to vector<4x8xi32>
    %16 = arith.andi %14, %15 : vector<4x8xi32>
    %c3_i32_4 = arith.constant 3 : i32
    %17 = vector.broadcast %c3_i32_4 : i32 to vector<4x8xi32>
    %18 = arith.shrsi %10, %17 : vector<4x8xi32>
    %c1_i32_5 = arith.constant 1 : i32
    %19 = vector.broadcast %c1_i32_5 : i32 to vector<4x8xi32>
    %20 = arith.andi %18, %19 : vector<4x8xi32>
    %c0_6 = arith.constant 0 : index
    %c0_7 = arith.constant 0 : index
    %c0_8 = arith.constant 0 : index
    %21 = vector.load %arg2[%c0_6, %c0_7, %c0_8] : memref<7x4x8xf32, #tpu.memory_space<vmem>>, vector<1x4x8xf32>
    %22 = vector.shape_cast %21 : vector<1x4x8xf32> to vector<4x8xf32>
    %c1 = arith.constant 1 : index
    %c0_9 = arith.constant 0 : index
    %c0_10 = arith.constant 0 : index
    %23 = vector.load %arg2[%c1, %c0_9, %c0_10] : memref<7x4x8xf32, #tpu.memory_space<vmem>>, vector<1x4x8xf32>
    %24 = vector.shape_cast %23 : vector<1x4x8xf32> to vector<4x8xf32>
    %c2 = arith.constant 2 : index
    %c0_11 = arith.constant 0 : index
    %c0_12 = arith.constant 0 : index
    %25 = vector.load %arg2[%c2, %c0_11, %c0_12] : memref<7x4x8xf32, #tpu.memory_space<vmem>>, vector<1x4x8xf32>
    %26 = vector.shape_cast %25 : vector<1x4x8xf32> to vector<4x8xf32>
    %27 = arith.maximumf %22, %24 : vector<4x8xf32>
    %28 = arith.minimumf %22, %24 : vector<4x8xf32>
    %29 = arith.maximumf %27, %26 : vector<4x8xf32>
    %30 = arith.cmpf oge, %26, %27 : vector<4x8xf32>
    %31 = arith.select %30, %27, %28 : vector<4x8xi1>, vector<4x8xf32>
    %32 = arith.select %30, %28, %26 : vector<4x8xi1>, vector<4x8xf32>
    %33 = arith.subf %31, %29 : vector<4x8xf32>
    %34 = math.exp %33 : vector<4x8xf32>
    %35 = arith.subf %32, %29 : vector<4x8xf32>
    %36 = math.exp %35 : vector<4x8xf32>
    %37 = arith.addf %34, %36 : vector<4x8xf32>
    %c0_i32_13 = arith.constant 0 : i32
    %38 = vector.broadcast %c0_i32_13 : i32 to vector<4x8xi32>
    %39 = arith.cmpi eq, %12, %38 : vector<4x8xi32>
    %c1_i32_14 = arith.constant 1 : i32
    %40 = vector.broadcast %c1_i32_14 : i32 to vector<4x8xi32>
    %41 = arith.cmpi eq, %12, %40 : vector<4x8xi32>
    %42 = arith.select %41, %24, %26 : vector<4x8xi1>, vector<4x8xf32>
    %43 = arith.select %39, %22, %42 : vector<4x8xi1>, vector<4x8xf32>
    %c3 = arith.constant 3 : index
    %c0_15 = arith.constant 0 : index
    %c0_16 = arith.constant 0 : index
    %44 = vector.load %arg2[%c3, %c0_15, %c0_16] : memref<7x4x8xf32, #tpu.memory_space<vmem>>, vector<1x4x8xf32>
    %45 = vector.shape_cast %44 : vector<1x4x8xf32> to vector<4x8xf32>
    %c4 = arith.constant 4 : index
    %c0_17 = arith.constant 0 : index
    %c0_18 = arith.constant 0 : index
    %46 = vector.load %arg2[%c4, %c0_17, %c0_18] : memref<7x4x8xf32, #tpu.memory_space<vmem>>, vector<1x4x8xf32>
    %47 = vector.shape_cast %46 : vector<1x4x8xf32> to vector<4x8xf32>
    %c5 = arith.constant 5 : index
    %c0_19 = arith.constant 0 : index
    %c0_20 = arith.constant 0 : index
    %48 = vector.load %arg2[%c5, %c0_19, %c0_20] : memref<7x4x8xf32, #tpu.memory_space<vmem>>, vector<1x4x8xf32>
    %49 = vector.shape_cast %48 : vector<1x4x8xf32> to vector<4x8xf32>
    %c6 = arith.constant 6 : index
    %c0_21 = arith.constant 0 : index
    %c0_22 = arith.constant 0 : index
    %50 = vector.load %arg2[%c6, %c0_21, %c0_22] : memref<7x4x8xf32, #tpu.memory_space<vmem>>, vector<1x4x8xf32>
    %51 = vector.shape_cast %50 : vector<1x4x8xf32> to vector<4x8xf32>
    %52 = arith.maximumf %45, %47 : vector<4x8xf32>
    %53 = arith.maximumf %49, %51 : vector<4x8xf32>
    %54 = arith.subf %45, %47 : vector<4x8xf32>
    %55 = math.absf %54 : vector<4x8xf32>
    %cst = arith.constant 0.000000e+00 : f32
    %56 = vector.broadcast %cst : f32 to vector<4x8xf32>
    %57 = arith.subf %56, %55 : vector<4x8xf32>
    %58 = math.exp %57 : vector<4x8xf32>
    %59 = arith.subf %49, %51 : vector<4x8xf32>
    %60 = math.absf %59 : vector<4x8xf32>
    %cst_23 = arith.constant 0.000000e+00 : f32
    %61 = vector.broadcast %cst_23 : f32 to vector<4x8xf32>
    %62 = arith.subf %61, %60 : vector<4x8xf32>
    %63 = math.exp %62 : vector<4x8xf32>
    %c0_i32_24 = arith.constant 0 : i32
    %64 = vector.broadcast %c0_i32_24 : i32 to vector<4x8xi32>
    %65 = arith.cmpi eq, %16, %64 : vector<4x8xi32>
    %66 = arith.select %65, %45, %47 : vector<4x8xi1>, vector<4x8xf32>
    %c0_i32_25 = arith.constant 0 : i32
    %67 = vector.broadcast %c0_i32_25 : i32 to vector<4x8xi32>
    %68 = arith.cmpi eq, %20, %67 : vector<4x8xi32>
    %69 = arith.select %68, %49, %51 : vector<4x8xi1>, vector<4x8xf32>
    %70 = arith.addf %58, %63 : vector<4x8xf32>
    %71 = arith.mulf %58, %63 : vector<4x8xf32>
    %72 = arith.addf %70, %71 : vector<4x8xf32>
    %73 = arith.addf %37, %72 : vector<4x8xf32>
    %74 = arith.mulf %37, %72 : vector<4x8xf32>
    %75 = arith.addf %73, %74 : vector<4x8xf32>
    %76 = math.log1p %75 : vector<4x8xf32>
    %77 = arith.addf %29, %52 : vector<4x8xf32>
    %78 = arith.addf %77, %53 : vector<4x8xf32>
    %79 = arith.addf %78, %76 : vector<4x8xf32>
    %80 = arith.addf %43, %66 : vector<4x8xf32>
    %81 = arith.addf %80, %69 : vector<4x8xf32>
    %82 = arith.subf %79, %81 : vector<4x8xf32>
    %cst_26 = arith.constant 0.000000e+00 : f32
    %83 = vector.broadcast %cst_26 : f32 to vector<4x8xf32>
    %84 = arith.select %9, %82, %83 : vector<4x8xi1>, vector<4x8xf32>
    %c0_27 = arith.constant 0 : index
    %c0_28 = arith.constant 0 : index
    %85 = vector.load %arg6[%c0_27, %c0_28] : memref<4x128xf32, #tpu.memory_space<vmem>>, vector<4x8xf32>
    %86 = arith.addf %85, %84 : vector<4x8xf32>
    %c0_29 = arith.constant 0 : index
    %c0_30 = arith.constant 0 : index
    %87 = vector.load %arg6[%c0_29, %c0_30] : memref<4x128xf32, #tpu.memory_space<vmem>>, vector<4x8xf32>
    tpu.vector_store %arg6[%c0_29, %c0_30], %86 {strides = array<i32>} : memref<4x128xf32, #tpu.memory_space<vmem>>, vector<4x8xf32>,
    %c0_i32_31 = arith.constant 0 : i32
    %88 = arith.cmpi eq, %arg1, %c0_i32_31 : i32
    %89 = arith.extui %88 : i1 to i32
    %c0_i32_32 = arith.constant 0 : i32
    %90 = arith.cmpi ne, %89, %c0_i32_32 : i32
    scf.if %90 {
      %c0_33 = arith.constant 0 : index
      %c0_34 = arith.constant 0 : index
      %91 = vector.load %arg6[%c0_33, %c0_34] : memref<4x128xf32, #tpu.memory_space<vmem>>, vector<4x128xf32>
      %cst_35 = arith.constant dense<0.000000e+00> : vector<4xf32>
      %92 = vector.multi_reduction <add>, %91, %cst_35 [1] : vector<4x128xf32> to vector<4xf32>
      %93 = vector.shape_cast %92 : vector<4xf32> to vector<4x1xf32>
      %94 = arith.sitofp %3 : vector<4x1xi32> to vector<4x1xf32>
      %c0_i32_36 = arith.constant 0 : i32
      %95 = vector.broadcast %c0_i32_36 : i32 to vector<4x1xi32>
      %96 = arith.cmpi sgt, %3, %95 : vector<4x1xi32>
      %cst_37 = arith.constant 1.000000e+00 : f32
      %97 = vector.broadcast %cst_37 : f32 to vector<4x1xf32>
      %98 = arith.select %96, %94, %97 : vector<4x1xi1>, vector<4x1xf32>
      %c0_i32_38 = arith.constant 0 : i32
      %99 = vector.broadcast %c0_i32_38 : i32 to vector<4x1xi32>
      %100 = arith.cmpi sgt, %3, %99 : vector<4x1xi32>
      %101 = arith.divf %93, %98 : vector<4x1xf32>
      %cst_39 = arith.constant 0.000000e+00 : f32
      %102 = vector.broadcast %cst_39 : f32 to vector<4x1xf32>
      %103 = arith.select %100, %101, %102 : vector<4x1xi1>, vector<4x1xf32>
      %c0_40 = arith.constant 0 : index
      %c0_41 = arith.constant 0 : index
      %104 = vector.load %arg5[%c0_40, %c0_41] : memref<4x1xf32, #tpu.memory_space<vmem>>, vector<4x1xf32>
      tpu.vector_store %arg5[%c0_40, %c0_41], %103 {strides = array<i32>} : memref<4x1xf32, #tpu.memory_space<vmem>>, vector<4x1xf32>,
    } else {
    }
    return
  }
  func.func @transform_0(%arg0: i32, %arg1: i32) -> (i32, i32, i32) {
    %c0_i32 = arith.constant 0 : i32
    %c0_i32_0 = arith.constant 0 : i32
    return %c0_i32, %arg0, %arg1 : i32, i32, i32
  }
  func.func @transform_1(%arg0: i32, %arg1: i32) -> (i32, i32) {
    %c0_i32 = arith.constant 0 : i32
    return %arg0, %arg1 : i32, i32
  }
  func.func @transform_2(%arg0: i32, %arg1: i32) -> (i32, i32) {
    %c0_i32 = arith.constant 0 : i32
    %c0_i32_0 = arith.constant 0 : i32
    return %arg0, %c0_i32 : i32, i32
  }
  func.func @transform_3(%arg0: i32, %arg1: i32) -> (i32, i32) {
    %c0_i32 = arith.constant 0 : i32
    %c0_i32_0 = arith.constant 0 : i32
    return %arg0, %c0_i32 : i32, i32
  }
}

</mosaic_0001>

<bundles_post_ra>
// kernel: turn_utterance_vad_ce_loss.1
= control target key start
LH: loop header
LB: loop body
LE: loop exit
PB: predicated region body
PF: predicated region fallthrough
CT: control target
= control target key end

     0   :  { %v148_v0 = vmov 0   ;;  %v149_v2 = vmov 0.0   ;;  %v20_v61 = vlaneseq  ;;  %vm105_vm7 = vcmask 60416   ;;  %s215_s2 = inlined_call_operand.vmem [shape: s32[4,1], index: 2, kind: input, shape index: {}]   ;;  %s216_s0 = inlined_call_operand.vmem [shape: f32[7,4,8], index: 0, kind: input, shape index: {}]   ;;  %s217_s1 = inlined_call_operand.vmem [shape: s32[4,8], index: 1, kind: input, shape index: {}]   ;;  %s218_s3 = inlined_call_operand.vmem [shape: f32[4,1], index: 3, kind: output, shape index: {}]  }
   0x1   :  { %135 = vset.pattern.permute.xlu0 %v148_v0  ;;  %v173_v1 = vld [vmem:[%s215_s2] sm:$0xf]  ;;  %18 = vst [vmem:[#allocation2] sm:$0xf] %v149_v2  ;;  %v129_v3 = vld [vmem:[%s216_s0 + $0xc] sm:$0xf] }
   0x2   :  { %26 = vperm.xlu0 %135, %v173_v1   ;;  %v130_v4 = vld [vmem:[%s216_s0 + $0x10] sm:$0xf]  ;;  %v185_v5 = vld [vmem:[%s216_s0 + $0x14] sm:$0xf]  ;;  %v190_v6 = vld [vmem:[%s216_s0 + $0x18] sm:$0xf] }
   0x3   :  { %v35_v7 = vld [vmem:[%s216_s0] sm:$0xf]  ;;  %v127_v8 = vld [vmem:[%s216_s0 + $0x4] sm:$0xf]  ;;  %v67_v9 = vsub.f32 %v129_v3, %v130_v4  ;;  %v72_v10 = vsub.f32 %v185_v5, %v190_v6  ;;  %v128_v12 = vld [vmem:[%s216_s0 + $0x8] sm:$0xf]  ;;  %v65_v45 = vmax.f32 %v129_v3, %v130_v4  ;;  %v66_v51 = vmax.f32 %v185_v5, %v190_v6 }
   0x4   :  { %v40_v11 = vmax.f32 %v35_v7, %v127_v8  ;;  %v41_v14 = vmin.f32 %v35_v7, %v127_v8  ;;  %v29_v39 = vld [vmem:[%s217_s1] sm:$0xf]  ;;  %v21_v0 = vand.u32 127, %v20_v61  ;;  %vm111_vm8 = vcmask 1043456  }
   0x5   :  { %v68_v13 = vand.u32 2147483647, %v67_v9  ;;  %v73_v15 = vand.u32 2147483647, %v72_v10  ;;  %v31_v40 = vshra.s32 %v29_v39, 2  ;;  %v30_v41 = vand.u32 3, %v29_v39 }
   0x6   :  { %vm43_vm0 = vcmp.ge.f32.partialorder %v128_v12, %v40_v11  ;;  %v42_v16 = vmax.f32 %v40_v11, %v128_v12  ;;  %v33_v44 = vshra.s32 %v29_v39, 3  ;;  %vm116_vm9 = vcmp.gt.s32.totalorder %v173_v1, 0 }
   0x7   :  { %v69_v17 = vsub.f32 0.0, %v68_v13  ;;  %v44_v18 = vsel %vm43_vm0, %v40_v11, %v41_v14  ;;  %v74_v19 = vsub.f32 0.0, %v73_v15  ;;  %v45_v20 = vsel %vm43_vm0, %v41_v14, %v128_v12 }
   0x8   :  { %v46_v21 = vsub.f32 %v44_v18, %v42_v16  ;;  %v49_v23 = vsub.f32 %v45_v20, %v42_v16  ;;  %v32_v43 = vand.u32 1, %v31_v40  ;;  %vm54_vm1 = vcmp.eq.s32.totalorder %v30_v41, 1 }
   0x9   :  { %v70_v22 = vmul.f32 1.442695, %v69_v17  ;;  %v75_v24 = vmul.f32 1.442695, %v74_v19  ;;  %vm53_vm2 = vcmp.eq.s32.totalorder %v30_v41, 0  ;;  %v34_v48 = vand.u32 1, %v33_v44 }
   0xa   :  { %v47_v25 = vmul.f32 1.442695, %v46_v21  ;;  %v50_v26 = vmul.f32 1.442695, %v49_v23  ;;  %v55_v49 = vsel %vm54_vm1, %v127_v8, %v128_v12  ;;  %vm77_vm3 = vcmp.eq.s32.totalorder %v32_v43, 0 }
   0xb   :  { %136 = vpow2.f32 %v70_v22  ;;  %v96_v52 = vadd.f32 %v65_v45, %v42_v16  ;;  %v56_v53 = vsel %vm53_vm2, %v35_v7, %v55_v49  ;;  %v78_v54 = vsel %vm77_vm3, %v129_v3, %v130_v4  ;;  %v103_v8 = vld [vmem:[#allocation2] sm:$0xf] }
   0xc   :  { %138 = vpow2.f32 %v75_v24  ;;  %vm79_vm4 = vcmp.eq.s32.totalorder %v34_v48, 0  ;;  %v99_v58 = vadd.f32 %v78_v54, %v56_v53  ;;  %v115_v11 = vcvt.s32.f32 %v173_v1 }
   0xd   :  { %140 = vpow2.f32 %v47_v25  ;;  %v97_v57 = vadd.f32 %v96_v52, %v66_v51  ;;  %v80_v59 = vsel %vm79_vm4, %v185_v5, %v190_v6  ;;  %vm121_vm10 = vcmask 3072  }
   0xe   :  { %142 = vpow2.f32 %v50_v26  ;;  %v100_v63 = vadd.f32 %v99_v58, %v80_v59  ;;  %v117_v5 = vsel %vm116_vm9, %v115_v11, 1.0 }
  0x15   :  { %v137_v27 = vpop.eup %136 }
  0x16   :  { %v139_v28 = vpop.eup %138 }
  0x17   :  { %v141_v29 = vpop.eup %140  ;;  %v81_v30 = vadd.f32 %v139_v28, %v137_v27  ;;  %v82_v31 = vmul.f32 %v139_v28, %v137_v27 }
  0x18   :  { %v143_v32 = vpop.eup %142 }
  0x19   :  { %v52_v33 = vadd.f32 %v143_v32, %v141_v29  ;;  %v83_v34 = vadd.f32 %v82_v31, %v81_v30 }
  0x1b   :  { %v84_v35 = vadd.f32 %v83_v34, %v52_v33  ;;  %v85_v36 = vmul.f32 %v83_v34, %v52_v33 }
  0x1d   :  { %v86_v37 = vadd.f32 %v85_v36, %v84_v35 }
  0x1f   :  { %v87_v38 = vadd.f32 1.0, %v86_v37  ;;  %v90_v42 = vmul.f32 -0.5, %v86_v37  ;;  %v93_v50 = vand.u32 2147483647, %v86_v37 }
  0x21   :  { %144 = vlog2.f32 %v87_v38  ;;  %v91_v46 = vadd.f32 1.0, %v90_v42  ;;  %vm94_vm5 = vcmp.lt.f32.partialorder %v93_v50, 0.0004427343 }
  0x22   :  { %146 = vrcp.f32 %v117_v5 }
  0x23   :  { %v92_v56 = vmul.f32 %v91_v46, %v86_v37 }
  0x2b   :  { %v145_v47 = vpop.eup %144 }
  0x2c   :  { %v89_v55 = vmul.f32 0.6931472, %v145_v47  ;;  %v147_v6 = vpop.eup %146 }
  0x2e   :  { %v95_v60 = vsel %vm94_vm5, %v92_v56, %v89_v55 }
  0x2f   :  { %v98_v62 = vadd.f32 %v97_v57, %v95_v60 }
  0x31   :  { %v101_v2 = vsub.f32 %v98_v62, %v100_v63 }
  0x81   :  { %v27_v9 = vpop.permute.xlu0 %26 }
  0x82   :  { %vm28_vm6 = vcmp.lt.s32.totalorder %v21_v0, %v27_v9 }
  0x83   :  { %v102_v3 = vsel %vm28_vm6, %v101_v2, 0.0 }
  0x84   :  { %v104_v4 = vadd.f32 %v103_v8, %v102_v3 }
  0x86   :  { %106 = vst.msk [vmem:[#allocation2] sm:$0xf] %vm105_vm7, %v104_v4 }
  0x8d   :  { %v110_v7 = vld [vmem:[#allocation2] sm:$0xf] }
  0x8e   :  { %v112_v10 = vsel %vm111_vm8, %v110_v7, 0.0 }
  0x8f   :  { %113 = vadd.xlane.f32.xlu0 %v112_v10 }
 0x11c   :  { %v114_v12 = vpop.xlane.xlu0 %113 }
 0x11d   :  { %v119_v13 = vmul.f32 %v147_v6, %v114_v12 }
 0x11f   :  { %v120_v14 = vsel %vm116_vm9, %v119_v13, 0.0 }
 0x120   :  { %122 = vst.msk [vmem:[%s218_s3] sm:$0xf] %vm121_vm10, %v120_v14 }

</bundles_post_ra>
